<compile_context>
chip_gen: v5e
topology: v5e:2x2
jax: 0.10.0
libtpu: 0.0.40
codegen_flags: <defaults>
</compile_context>

<pallas_src>
import functools

import jax
import jax.numpy as jnp
from jax import lax
from jax.experimental import pallas as pl
from jax.experimental.pallas import tpu as pltpu


def _rec_loss_kernel(preds_ref, tgt_ref, out_ref, *, ignore_index, flag, n_rows):
    i = pl.program_id(0)

    x = preds_ref[...]                              # (TN, V), native dtype
    tgt = tgt_ref[...]                              # (TN, 1) int32
    tn, v = x.shape

    # x[row, tgt[row]] via int-compare + select; the lane-sum of a one-hot row
    # is exact in any float dtype, so only the (TN, 1) result is cast to f32.
    col = lax.broadcasted_iota(jnp.int32, (tn, v), 1)
    sel = col == tgt                                # (TN, V) bool
    zero = jnp.array(0, dtype=x.dtype)
    tgt_x = jnp.sum(jnp.where(sel, x, zero), axis=-1,
                    keepdims=True).astype(jnp.float32)          # (TN, 1) f32

    if flag == "logits":
        m = jnp.max(x, axis=-1, keepdims=True)                  # native dtype
        xm = (x - m).astype(jnp.float32)                        # only f32 cast
        lse = jnp.log(jnp.sum(jnp.exp(xm), axis=-1, keepdims=True)) \
              + m.astype(jnp.float32)
        tgt_logp = tgt_x - lse
    elif flag == "probs":
        tgt_logp = jnp.log(tgt_x)
    else:
        raise ValueError("flag must be 'logits' or 'probs'")

    # Row validity: not ignore_index AND inside the real (unpadded) row range.
    row = lax.broadcasted_iota(jnp.int32, (tn, 1), 0) + i * tn
    valid = (tgt != ignore_index) & (row < n_rows)              # (TN, 1)
    # select (not mask-multiply): ignored/padded rows may hold -inf / NaN.
    contrib = jnp.where(valid, -tgt_logp, 0.0)

    partial = jnp.sum(contrib)                                  # scalar f32
    # Lane/sublane-aligned (1, 8, 128) partial tile -> plain unmasked store.
    out_ref[...] = jnp.broadcast_to(partial, out_ref.shape).astype(jnp.float32)


def _vmem_capacity_bytes():
    try:
        return int(pltpu.get_tpu_info().vmem_capacity_bytes)
    except Exception:
        return 64 * 1024 * 1024   # conservative fallback (v7x per-TensorCore)


def rec_loss(preds, targets, length=None, flag="logits", ignore_index=0,
             row_tile=None):
    """Pallas equivalent of _REC_LOSS.forward.

    preds:   (..., V) logits (flag='logits') or probs (flag='probs'), any float dtype
    targets: (...)    int class ids
    length:  unused (kept for API parity with the PyTorch module)
    Returns a float32 scalar: sum of NLL over non-ignored positions.
    """
    del length  # unused in the reference forward as well
    if flag not in ("logits", "probs"):
        raise ValueError("flag must be 'logits' or 'probs'")

    v = preds.shape[-1]
    preds2d = preds.reshape(-1, v)                  # native dtype, no cast/copy
    tgt2d = targets.reshape(-1, 1).astype(jnp.int32)
    n = preds2d.shape[0]

    itemsize = jnp.dtype(preds2d.dtype).itemsize
    sub = max(8, 32 // max(1, itemsize))            # 8 f32, 16 bf16, 32 int8/fp8
    v_lanes = pl.cdiv(v, 128) * 128

    # Per-row VMEM estimate: 2 double-buffered preds blocks (native dtype),
    # 2 lane-padded int32 target blocks, ~5 live f32-sized (TN, V) temporaries.
    per_row = v_lanes * (2 * itemsize + 5 * 4) + 2 * 128 * 4

    cap = _vmem_capacity_bytes()
    tile_budget = int(cap * 0.30)                   # ~19 MiB v7x, ~38 MiB v5e/v6e
    if row_tile is None:
        row_tile = tile_budget // per_row
    row_tile = int(min(row_tile, 4096, pl.cdiv(n, sub) * sub))
    row_tile = max(sub, (row_tile // sub) * sub)

    num_blocks = pl.cdiv(n, row_tile)

    footprint = row_tile * per_row + (1 << 16)
    vmem_limit = int(min(0.8 * cap, max(0.5 * cap, 1.5 * footprint)))

    kernel = functools.partial(
        _rec_loss_kernel, ignore_index=int(ignore_index), flag=flag, n_rows=n)

    partials = pl.pallas_call(
        kernel,
        out_shape=jax.ShapeDtypeStruct((num_blocks, 8, 128), jnp.float32),
        grid_spec=pltpu.PrefetchScalarGridSpec(
            num_scalar_prefetch=0,
            grid=(num_blocks,),
            in_specs=[
                pl.BlockSpec((row_tile, v), lambda i: (i, 0)),
                pl.BlockSpec((row_tile, 1), lambda i: (i, 0)),
            ],
            out_specs=pl.BlockSpec((1, 8, 128), lambda i: (i, 0, 0)),
        ),
        compiler_params=pltpu.CompilerParams(
            dimension_semantics=("parallel",),
            vmem_limit_bytes=vmem_limit,
        ),
    )(preds2d, tgt2d)

    # Tiny external reduction over the per-block partials (one f32 per block).
    return jnp.sum(partials[:, 0, 0])


def _reference(preds, targets, flag="logits", ignore_index=0):
    v = preds.shape[-1]
    x = preds.reshape(-1, v).astype(jnp.float32)
    t = targets.reshape(-1).astype(jnp.int32)
    logp = jax.nn.log_softmax(x, axis=-1) if flag == "logits" else jnp.log(x)
    picked = jnp.take_along_axis(logp, t[:, None], axis=-1)[:, 0]
    mask = t != ignore_index
    return jnp.sum(jnp.where(mask, -picked, 0.0))


if __name__ == "__main__":
    key = jax.random.PRNGKey(0)
    B, T, V = 2, 8, 32
    ignore_index = 0

    k1, k2, k3, k4 = jax.random.split(key, 4)
    preds = jax.random.normal(k1, (B, T, V), dtype=jnp.float32)      # logits
    targets = jax.random.randint(k2, (B, T), 0, V, dtype=jnp.int32)
    targets = targets.at[0, 0].set(ignore_index)                     # ignore path
    length = jnp.full((B,), T, dtype=jnp.int32)                      # unused, API parity

    # 1) logits mode, f32
    loss = jax.block_until_ready(
        rec_loss(preds, targets, length, flag="logits", ignore_index=ignore_index))
    ref = _reference(preds, targets, flag="logits", ignore_index=ignore_index)
    assert jnp.allclose(loss, ref, rtol=1e-5, atol=1e-4), (loss, ref)

    # 2) probs mode, with a zero probability on an ignored row (NaN regression check)
    probs = jax.nn.softmax(preds, axis=-1)
    probs = probs.at[0, 0, int(targets[0, 0])].set(0.0)
    loss_p = jax.block_until_ready(
        rec_loss(probs, targets, length, flag="probs", ignore_index=ignore_index))
    ref_p = _reference(probs, targets, flag="probs", ignore_index=ignore_index)
    assert bool(jnp.isfinite(loss_p)), loss_p
    assert jnp.allclose(loss_p, ref_p, rtol=1e-5, atol=1e-4), (loss_p, ref_p)

    # 3) ragged tail: n not a multiple of row_tile, multi-block parallel grid
    Nr, Vr = 13, 40
    preds_r = jax.random.normal(k3, (Nr, Vr), dtype=jnp.float32)
    targets_r = jax.random.randint(k4, (Nr,), 0, Vr, dtype=jnp.int32)
    targets_r = targets_r.at[3].set(ignore_index)
    loss_r = jax.block_until_ready(
        rec_loss(preds_r, targets_r, None, flag="logits",
                 ignore_index=ignore_index, row_tile=8))
    ref_r = _reference(preds_r, targets_r, flag="logits", ignore_index=ignore_index)
    assert jnp.allclose(loss_r, ref_r, rtol=1e-5, atol=1e-4), (loss_r, ref_r)

    # 4) bf16 logits (native-dtype compare/max path; looser tolerance)
    preds_bf = preds.astype(jnp.bfloat16)
    loss_bf = jax.block_until_ready(
        rec_loss(preds_bf, targets, length, flag="logits", ignore_index=ignore_index))
    ref_bf = _reference(preds_bf, targets, flag="logits", ignore_index=ignore_index)
    assert jnp.allclose(loss_bf, ref_bf, rtol=2e-2, atol=0.5), (loss_bf, ref_bf)

    print("KERNEL_OK")
</pallas_src>

<mosaic_0001>
module attributes {stable_mosaic.version = 11 : i64} {
  func.func @_rec_loss_kernel(%arg0: i32, %arg1: memref<16x32xf32, #tpu.memory_space<vmem>>, %arg2: memref<16x1xi32, #tpu.memory_space<vmem>>, %arg3: memref<1x8x128xf32, #tpu.memory_space<vmem>>) attributes {dimension_semantics = [#tpu.dimension_semantics<parallel>], iteration_bounds = array<i64: 1>, scalar_prefetch = 0 : i64, scratch_operands = 0 : i64, tpu.core_type = #tpu.core_type<tc>, window_params = [{transform_indices = @transform_0, window_bounds = array<i64: 16, 32>}, {transform_indices = @transform_1, window_bounds = array<i64: 16, 1>}, {transform_indices = @transform_2, window_bounds = array<i64: 1, 8, 128>}]} {
    %c0 = arith.constant 0 : index
    %c0_0 = arith.constant 0 : index
    %0 = vector.load %arg1[%c0, %c0_0] : memref<16x32xf32, #tpu.memory_space<vmem>>, vector<16x32xf32>
    %c0_1 = arith.constant 0 : index
    %c0_2 = arith.constant 0 : index
    %1 = vector.load %arg2[%c0_1, %c0_2] : memref<16x1xi32, #tpu.memory_space<vmem>>, vector<16x1xi32>
    %2 = tpu.iota {dimensions = array<i32: 1>} : vector<16x32xi32>
    %3 = vector.broadcast %1 : vector<16x1xi32> to vector<16x32xi32>
    %4 = arith.cmpi eq, %2, %3 : vector<16x32xi32>
    %cst = arith.constant 0.000000e+00 : f32
    %5 = vector.broadcast %cst : f32 to vector<16x32xf32>
    %6 = arith.select %4, %0, %5 : vector<16x32xi1>, vector<16x32xf32>
    %cst_3 = arith.constant dense<0.000000e+00> : vector<16xf32>
    %7 = vector.multi_reduction <add>, %6, %cst_3 [1] : vector<16x32xf32> to vector<16xf32>
    %8 = vector.shape_cast %7 : vector<16xf32> to vector<16x1xf32>
    %cst_4 = arith.constant dense<0xFF800000> : vector<16xf32>
    %9 = vector.multi_reduction <maximumf>, %0, %cst_4 [1] : vector<16x32xf32> to vector<16xf32>
    %10 = vector.shape_cast %9 : vector<16xf32> to vector<16x1xf32>
    %11 = vector.broadcast %10 : vector<16x1xf32> to vector<16x32xf32>
    %12 = arith.subf %0, %11 : vector<16x32xf32>
    %13 = math.exp %12 : vector<16x32xf32>
    %cst_5 = arith.constant dense<0.000000e+00> : vector<16xf32>
    %14 = vector.multi_reduction <add>, %13, %cst_5 [1] : vector<16x32xf32> to vector<16xf32>
    %15 = vector.shape_cast %14 : vector<16xf32> to vector<16x1xf32>
    %16 = math.log %15 : vector<16x1xf32>
    %17 = arith.addf %16, %10 : vector<16x1xf32>
    %18 = arith.subf %8, %17 : vector<16x1xf32>
    %19 = tpu.iota {dimensions = array<i32: 0>} : vector<16x1xi32>
    %c16_i32 = arith.constant 16 : i32
    %20 = arith.muli %arg0, %c16_i32 : i32
    %21 = vector.broadcast %20 : i32 to vector<16x1xi32>
    %22 = arith.addi %19, %21 : vector<16x1xi32>
    %c0_i32 = arith.constant 0 : i32
    %23 = vector.broadcast %c0_i32 : i32 to vector<16x1xi32>
    %24 = arith.cmpi ne, %1, %23 : vector<16x1xi32>
    %c16_i32_6 = arith.constant 16 : i32
    %25 = vector.broadcast %c16_i32_6 : i32 to vector<16x1xi32>
    %26 = arith.cmpi slt, %22, %25 : vector<16x1xi32>
    %27 = arith.andi %24, %26 : vector<16x1xi1>
    %cst_7 = arith.constant 0.000000e+00 : f32
    %28 = vector.broadcast %cst_7 : f32 to vector<16x1xf32>
    %29 = arith.subf %28, %18 : vector<16x1xf32>
    %cst_8 = arith.constant 0.000000e+00 : f32
    %30 = vector.broadcast %cst_8 : f32 to vector<16x1xf32>
    %31 = arith.select %27, %29, %30 : vector<16x1xi1>, vector<16x1xf32>
    %32 = vector.shape_cast %31 : vector<16x1xf32> to vector<1x16x1xf32>
    %cst_9 = arith.constant dense<0.000000e+00> : vector<1xf32>
    %33 = vector.multi_reduction <add>, %32, %cst_9 [1, 2] : vector<1x16x1xf32> to vector<1xf32>
    %34 = vector.shape_cast %33 : vector<1xf32> to vector<1x1x1xf32>
    %35 = vector.extract %34[0, 0, 0] : f32 from vector<1x1x1xf32>
    %36 = vector.broadcast %35 : f32 to vector<1x8x128xf32>
    %c0_10 = arith.constant 0 : index
    %c0_11 = arith.constant 0 : index
    %c0_12 = arith.constant 0 : index
    %37 = vector.load %arg3[%c0_10, %c0_11, %c0_12] : memref<1x8x128xf32, #tpu.memory_space<vmem>>, vector<1x8x128xf32>
    tpu.vector_store %arg3[%c0_10, %c0_11, %c0_12], %36 {strides = array<i32>} : memref<1x8x128xf32, #tpu.memory_space<vmem>>, vector<1x8x128xf32>,
    return
  }
  func.func @transform_0(%arg0: i32) -> (i32, i32) {
    %c0_i32 = arith.constant 0 : i32
    %c0_i32_0 = arith.constant 0 : i32
    return %arg0, %c0_i32 : i32, i32
  }
  func.func @transform_1(%arg0: i32) -> (i32, i32) {
    %c0_i32 = arith.constant 0 : i32
    %c0_i32_0 = arith.constant 0 : i32
    return %arg0, %c0_i32 : i32, i32
  }
  func.func @transform_2(%arg0: i32) -> (i32, i32, i32) {
    %c0_i32 = arith.constant 0 : i32
    %c0_i32_0 = arith.constant 0 : i32
    %c0_i32_1 = arith.constant 0 : i32
    return %arg0, %c0_i32, %c0_i32_0 : i32, i32, i32
  }
}

</mosaic_0001>

<bundles_post_ra>
// kernel: tpu_custom_call.1
= control target key start
LH: loop header
LB: loop body
LE: loop exit
PB: predicated region body
PF: predicated region fallthrough
CT: control target
= control target key end

     0   :  { %vm28_vm0 = vcmask 261120   ;;  %v149_v3 = vmov 0   ;;  %s187_s0 = inlined_call_operand.vmem [shape: f32[16,32], index: 0, kind: input, shape index: {}]   ;;  %s188_s1 = inlined_call_operand.vmem [shape: s32[16,1], index: 1, kind: input, shape index: {}]   ;;  %s189_s2 = inlined_call_operand.hbm [shape: f32[1,8,128], index: 2, kind: output, shape index: {}]  }
   0x1   :  { %v12_v0 = vld [vmem:[%s187_s0] sm:$0xff]  ;;  %113 = vset.pattern.permute.xlu1 %v149_v3  ;;  %114 = vset.pattern.permute.xlu0 %v149_v3 }
   0x2   :  { %v14_v1 = vld [vmem:[%s188_s1] sm:$0xff]  ;;  %v35_v2 = vsel %vm28_vm0, %v12_v0, -inf }
   0x3   :  { %7 = vsyncpa [#allocation3], 0  ;;  %36 = vmax.xlane.f32.xlu0 %v35_v2  ;;  %19 = vperm.xlu1 %113, %v14_v1   ;;  %v13_v4 = vld [vmem:[%s187_s0 + $0x8] sm:$0xff]  ;;  %v16_v7 = vlaneseq  ;;  %vm68_vm3 = vcmp.ne.s32.totalorder %v14_v1, 0  ;;  %vm78_vm5 = vcmask 7168   ;;  %s150_s0 = smov [#allocation2]  }
   0x4   :  { %v38_v5 = vsel %vm28_vm0, %v13_v4, -inf  ;;  %v15_v6 = vld [vmem:[%s188_s1 + $0x8] sm:$0xff]  ;;  %s98_s1 = sshll.u32 %s150_s0, 4  ;;  %s100_s19 = sshll.u32 %s189_s2, 4  ;;  %s99_s1 = int_to_ptr.vmem [resolvable:$true] %s98_s1  ;;  %s101_s19 = int_to_ptr.hbm [resolvable:$true] %s100_s19 }
   0x5   :  { %v17_v8 = vand.u32 127, %v16_v7  ;;  %vm69_vm4 = vcmp.ne.s32.totalorder %v15_v6, 0 }
   0xb   :  { %39 = vmax.xlane.f32.xlu0 %v38_v5  ;;  %22 = vperm.xlu1 %113, %v15_v6  }
  0x75   :  { %v20_v9 = vpop.permute.xlu1 %19 }
  0x76   :  { %v37_v10 = vpop.xlane.xlu0 %36  ;;  %vm24_vm1 = vcmp.eq.s32.totalorder %v17_v8, %v20_v9 }
  0x77   :  { %v41_v11 = vsub.f32 %v12_v0, %v37_v10  ;;  %v26_v12 = vsel %vm24_vm1, %v12_v0, 0.0 }
  0x78   :  { %v29_v13 = vsel %vm28_vm0, %v26_v12, 0.0 }
  0x79   :  { %v43_v14 = vmul.f32 1.442695, %v41_v11  ;;  %30 = vadd.xlane.f32.xlu0 %v29_v13 }
  0x7b   :  { %115 = vpow2.f32 %v43_v14 }
  0x7d   :  { %v23_v15 = vpop.permute.xlu1 %22 }
  0x7e   :  { %v40_v16 = vpop.xlane.xlu0 %39  ;;  %vm25_vm2 = vcmp.eq.s32.totalorder %v17_v8, %v23_v15 }
  0x7f   :  { %v42_v17 = vsub.f32 %v13_v4, %v40_v16  ;;  %v27_v18 = vsel %vm25_vm2, %v13_v4, 0.0 }
  0x80   :  { %v32_v19 = vsel %vm28_vm0, %v27_v18, 0.0 }
  0x81   :  { %v116_v20 = vpop.eup %115  ;;  %v45_v21 = vmul.f32 1.442695, %v42_v17  ;;  %33 = vadd.xlane.f32.xlu1 %v32_v19 }
  0x82   :  { %v47_v22 = vsel %vm28_vm0, %v116_v20, 0.0 }
  0x83   :  { %117 = vpow2.f32 %v45_v21  ;;  %48 = vadd.xlane.f32.xlu2 %v47_v22 }
  0x89   :  { %v118_v23 = vpop.eup %117 }
  0x8a   :  { %v50_v24 = vsel %vm28_vm0, %v118_v23, 0.0 }
  0x8b   :  { %51 = vadd.xlane.f32.xlu2 %v50_v24 }
  0xec   :  { %v31_v30 = vpop.xlane.xlu0 %30 }
  0xf4   :  { %v34_v36 = vpop.xlane.xlu1 %33 }
  0xf6   :  { %v49_v25 = vpop.xlane.xlu2 %48 }
  0xf7   :  { %119 = vlog2.f32 %v49_v25 }
  0xfd   :  { %v120_v26 = vpop.eup %119 }
  0xfe   :  { %v54_v27 = vmul.f32 0.6931472, %v120_v26  ;;  %v52_v28 = vpop.xlane.xlu2 %51 }
  0xff   :  { %121 = vlog2.f32 %v52_v28 }
 0x100   :  { %v57_v29 = vadd.f32 %v54_v27, %v37_v10 }
 0x102   :  { %v59_v31 = vsub.f32 %v31_v30, %v57_v29 }
 0x104   :  { %v74_v35 = vsub.f32 0.0, %v59_v31 }
 0x105   :  { %v122_v32 = vpop.eup %121 }
 0x106   :  { %v56_v33 = vmul.f32 0.6931472, %v122_v32  ;;  %v76_v39 = vsel %vm68_vm3, %v74_v35, 0.0 }
 0x107   :  { %v79_v41 = vsel %vm78_vm5, %v76_v39, 0.0 }
 0x108   :  { %v58_v34 = vadd.f32 %v56_v33, %v40_v16 }
 0x10a   :  { %v60_v37 = vsub.f32 %v34_v36, %v58_v34 }
 0x10c   :  { %v75_v38 = vsub.f32 0.0, %v60_v37 }
 0x10e   :  { %v77_v40 = vsel %vm69_vm4, %v75_v38, 0.0 }
 0x10f   :  { %v80_v42 = vsel %vm78_vm5, %v77_v40, 0.0 }
 0x110   :  { %v81_v43 = vadd.f32 %v80_v42, %v79_v41 }
 0x112   :  { %82 = vadd.xlane.f32.xlu2 %v81_v43 }
 0x185   :  { %v83_v44 = vpop.xlane.xlu2 %82 }
 0x186   :  { %v84_v45 = vrot.slane %v83_v44, 4 }
 0x188   :  { %v85_v46 = vadd.f32 %v84_v45, %v83_v44 }
 0x18a   :  { %v86_v47 = vrot.slane %v85_v46, 2 }
 0x18c   :  { %v87_v48 = vadd.f32 %v86_v47, %v85_v46 }
 0x18e   :  { %v88_v49 = vrot.slane %v87_v48, 1 }
 0x190   :  { %v89_v50 = vadd.f32 %v88_v49, %v87_v48 }
 0x192   :  { %109 = vpush %v89_v50 }
 0x1c3   :  { %s110_s20 = spop %109 }
 0x1c4   :  { %v91_v51 = vstv %s110_s20 }
 0x1c5   :  { %92 = vst [vmem:[#allocation2] sm:$0xff] %v91_v51 }
 0x1c6   :  { %103 = dma.vmem_to_hbm [thread:$0]  %s99_s1, 128, %s101_s19, [#allocation3]  }
 0x1c7   :  { %147 = dma.done.wait [#allocation3], 128  }
 0x1c8   :  { %148 = vsyncadd [#allocation3], 4294967168 }
 0x1c9   :  { %108 = vsyncpa [#allocation3], 1 }

</bundles_post_ra>
